<compile_context>
chip_gen: v7x
topology: tpu7x:2x2x1
jax: 0.10.0
libtpu: 0.0.40
codegen_flags: <defaults>
</compile_context>

<pallas_src>
import functools

import jax
import jax.numpy as jnp
from jax import lax
from jax.experimental import pallas as pl
from jax.experimental.pallas import tpu as pltpu

ALPHA = 0.1     # APPNP teleport probability
NUM_PROP = 10   # APPNP K


def _round_up(v, m):
    return ((v + m - 1) // m) * m


def _appnp_kernel(x_ref, adj_ref, w1_ref, w2_ref, b_ref, out_ref,
                  z0_ref, zbuf_ref, *, alpha, num_classes, d_pad, c_pad):
    """grid = (NUM_PROP + 1, num_row_tiles): phase 0 = MLP init, phases 1..K = propagation."""
    k = pl.program_id(0)              # phase (slow grid axis)
    i = pl.program_id(1)              # row-tile index (fast grid axis)
    last = pl.num_programs(0) - 1
    tile = out_ref.shape[0]
    row0 = pl.multiple_of(i * tile, tile)

    @pl.when(k == 0)
    def _init():
        # z0 = relu(x @ W1 + b1) @ W2 + b2  for this row tile (bf16 MXU, f32 accumulate)
        h = jnp.dot(x_ref[...], w1_ref[...], preferred_element_type=jnp.float32)
        h = jnp.maximum(h + b_ref[0:1, :d_pad], 0.0)                  # [tile, D_pad] f32
        z0 = jnp.dot(h.astype(jnp.bfloat16), w2_ref[...],
                     preferred_element_type=jnp.float32)
        z0 = z0 + b_ref[1:2, :c_pad]                                  # [tile, C_pad] f32
        z0_ref[pl.ds(row0, tile), :] = z0
        zbuf_ref[0, pl.ds(row0, tile), :] = z0
        out_ref[...] = z0   # keep the output buffer defined (benign intermediate writeback)

    @pl.when(k > 0)
    def _propagate():
        prev = (k - 1) % 2
        cur = k % 2
        # z_k[tile] = (1 - alpha) * A_hat[tile, :] @ z_{k-1} + alpha * z0[tile]
        z_prev = zbuf_ref[prev]                                       # [N, C_pad] f32
        agg = jnp.dot(adj_ref[...], z_prev.astype(jnp.bfloat16),
                      preferred_element_type=jnp.float32)             # [tile, C_pad] f32
        z_new = (1.0 - alpha) * agg + alpha * z0_ref[pl.ds(row0, tile), :]
        zbuf_ref[cur, pl.ds(row0, tile), :] = z_new

        @pl.when(k < last)
        def _():
            out_ref[...] = z_new

        @pl.when(k == last)
        def _():
            # mask zero-padded class lanes, then numerically-stable log_softmax (f32)
            col = lax.broadcasted_iota(jnp.int32, z_new.shape, 1)
            logits = jnp.where(col < num_classes, z_new, -1e30)
            m = jnp.max(logits, axis=1, keepdims=True)
            zc = logits - m
            lse = jnp.log(jnp.sum(jnp.exp(zc), axis=1, keepdims=True))
            out_ref[...] = zc - lse


def appnp_forward(x, adj, params, *, alpha=ALPHA, num_prop=NUM_PROP, row_tile=32):
    n, f = x.shape
    d = params["w1"].shape[1]
    c = params["w2"].shape[1]

    f_pad = _round_up(f, 128)
    d_pad = _round_up(d, 128)
    c_pad = _round_up(c, 128)
    b_width = max(d_pad, c_pad)

    tile = row_tile if (n % row_tile == 0) else n
    num_tiles = n // tile

    # Lane-dense, MXU-friendly zero padding; bf16 operands, f32 accumulation.
    x_p = jnp.pad(x, ((0, 0), (0, f_pad - f))).astype(jnp.bfloat16)
    adj_b = adj.astype(jnp.bfloat16)
    w1_p = jnp.pad(params["w1"], ((0, f_pad - f), (0, d_pad - d))).astype(jnp.bfloat16)
    w2_p = jnp.pad(params["w2"], ((0, d_pad - d), (0, c_pad - c))).astype(jnp.bfloat16)
    # Pack both tiny biases into one VMEM tile -> one DMA instead of two.
    b_p = jnp.zeros((2, b_width), jnp.float32)
    b_p = b_p.at[0, :d].set(params["b1"].reshape(-1))
    b_p = b_p.at[1, :c].set(params["b2"].reshape(-1))

    kernel = functools.partial(_appnp_kernel, alpha=alpha, num_classes=c,
                               d_pad=d_pad, c_pad=c_pad)

    grid_spec = pltpu.PrefetchScalarGridSpec(
        num_scalar_prefetch=0,
        grid=(num_prop + 1, num_tiles),
        in_specs=[
            pl.BlockSpec((tile, f_pad),  lambda k, i: (i, 0)),   # x row tile (used at k==0)
            pl.BlockSpec((tile, n),      lambda k, i: (i, 0)),   # A_hat row tile (streamed)
            pl.BlockSpec((f_pad, d_pad), lambda k, i: (0, 0)),   # W1 (resident)
            pl.BlockSpec((d_pad, c_pad), lambda k, i: (0, 0)),   # W2 (resident)
            pl.BlockSpec((2, b_width),   lambda k, i: (0, 0)),   # packed biases (resident)
        ],
        out_specs=pl.BlockSpec((tile, c_pad), lambda k, i: (i, 0)),
        scratch_shapes=[
            pltpu.VMEM((n, c_pad), jnp.float32),      # z0 (alpha-residual), full graph
            pltpu.VMEM((2, n, c_pad), jnp.float32),   # ping-pong carry of z_k
        ],
    )

    out_padded = pl.pallas_call(
        kernel,
        out_shape=jax.ShapeDtypeStruct((n, c_pad), jnp.float32),
        grid_spec=grid_spec,
        compiler_params=pltpu.CompilerParams(
            # z is carried across grid steps in scratch => both axes must be sequential.
            dimension_semantics=("arbitrary", "arbitrary"),
            vmem_limit_bytes=32 * 1024 * 1024,
        ),
    )(x_p, adj_b, w1_p, w2_p, b_p)

    return out_padded[:, :c]


def build_params(key, num_features, dim, num_classes):
    ks = jax.random.split(key, 4)

    def glorot(k, fan_in, fan_out):
        std = jnp.sqrt(2.0 / (fan_in + fan_out))
        return std * jax.random.normal(k, (fan_in, fan_out), jnp.float32)

    bound1 = 1.0 / jnp.sqrt(float(num_features))
    bound2 = 1.0 / jnp.sqrt(float(dim))
    return {
        "w1": glorot(ks[0], num_features, dim),
        "b1": jax.random.uniform(ks[1], (dim,), jnp.float32, -bound1, bound1),
        "w2": glorot(ks[2], dim, num_classes),
        "b2": jax.random.uniform(ks[3], (num_classes,), jnp.float32, -bound2, bound2),
    }


def build_normalized_adj(key, n, p_edge=0.1):
    # random symmetric graph + self loops + GCN symmetric normalization
    a = (jax.random.uniform(key, (n, n)) < p_edge).astype(jnp.float32)
    a = jnp.maximum(a, a.T)
    a = a * (1.0 - jnp.eye(n, dtype=jnp.float32)) + jnp.eye(n, dtype=jnp.float32)
    deg = jnp.sum(a, axis=1)
    d_inv_sqrt = 1.0 / jnp.sqrt(deg)
    return a * d_inv_sqrt[:, None] * d_inv_sqrt[None, :]


if __name__ == "__main__":
    N, NUM_FEATURES, DIM, NUM_CLASSES = 64, 16, 32, 8

    root = jax.random.PRNGKey(0)
    k_x, k_adj, k_par = jax.random.split(root, 3)

    x = jax.random.normal(k_x, (N, NUM_FEATURES), jnp.float32)
    adj = build_normalized_adj(k_adj, N)
    params = build_params(k_par, NUM_FEATURES, DIM, NUM_CLASSES)

    out = appnp_forward(x, adj, params)
    out = jax.block_until_ready(out)

    assert out.shape == (N, NUM_CLASSES)
    # log_softmax sanity: rows of exp(out) must sum to ~1
    assert bool(jnp.all(jnp.abs(jnp.sum(jnp.exp(out), axis=1) - 1.0) < 1e-4))
    print("KERNEL_OK")
</pallas_src>

<mosaic_0001>
module attributes {stable_mosaic.version = 11 : i64} {
  func.func @_appnp_kernel(%arg0: i32, %arg1: i32, %arg2: memref<32x128xbf16, #tpu.memory_space<vmem>>, %arg3: memref<32x64xbf16, #tpu.memory_space<vmem>>, %arg4: memref<128x128xbf16, #tpu.memory_space<vmem>>, %arg5: memref<128x128xbf16, #tpu.memory_space<vmem>>, %arg6: memref<2x128xf32, #tpu.memory_space<vmem>>, %arg7: memref<32x128xf32, #tpu.memory_space<vmem>>, %arg8: memref<64x128xf32, #tpu.memory_space<vmem>>, %arg9: memref<2x64x128xf32, #tpu.memory_space<vmem>>) attributes {dimension_semantics = [#tpu.dimension_semantics<arbitrary>, #tpu.dimension_semantics<arbitrary>], iteration_bounds = array<i64: 11, 2>, scalar_prefetch = 0 : i64, scratch_operands = 2 : i64, tpu.core_type = #tpu.core_type<tc>, window_params = [{transform_indices = @transform_0, window_bounds = array<i64: 32, 128>}, {transform_indices = @transform_1, window_bounds = array<i64: 32, 64>}, {pipeline_mode = #tpu.pipeline_mode<synchronous>, transform_indices = @transform_2, window_bounds = array<i64: 128, 128>}, {pipeline_mode = #tpu.pipeline_mode<synchronous>, transform_indices = @transform_3, window_bounds = array<i64: 128, 128>}, {pipeline_mode = #tpu.pipeline_mode<synchronous>, transform_indices = @transform_4, window_bounds = array<i64: 2, 128>}, {transform_indices = @transform_5, window_bounds = array<i64: 32, 128>}]} {
    %c32_i32 = arith.constant 32 : i32
    %0 = arith.muli %arg1, %c32_i32 : i32
    %1 = tpu.assume_multiple %0, 32 : i32
    %c0_i32 = arith.constant 0 : i32
    %2 = arith.cmpi eq, %arg0, %c0_i32 : i32
    %3 = arith.extui %2 : i1 to i32
    %c0_i32_0 = arith.constant 0 : i32
    %4 = arith.cmpi ne, %3, %c0_i32_0 : i32
    scf.if %4 {
      %c0 = arith.constant 0 : index
      %c0_3 = arith.constant 0 : index
      %8 = vector.load %arg2[%c0, %c0_3] : memref<32x128xbf16, #tpu.memory_space<vmem>>, vector<32x128xbf16>
      %c0_4 = arith.constant 0 : index
      %c0_5 = arith.constant 0 : index
      %9 = vector.load %arg4[%c0_4, %c0_5] : memref<128x128xbf16, #tpu.memory_space<vmem>>, vector<128x128xbf16>
      %cst = arith.constant dense<0.000000e+00> : vector<32x128xf32>
      %10 = tpu.matmul %8, %9, %cst {dimension_numbers = #tpu.dot_dimension_numbers<[1], [0], [0], [1], [0, 0, 1, 1], [], []>} : vector<32x128xbf16>, vector<128x128xbf16>, vector<32x128xf32> -> vector<32x128xf32>
      %c0_6 = arith.constant 0 : index
      %c0_7 = arith.constant 0 : index
      %11 = vector.load %arg6[%c0_6, %c0_7] : memref<2x128xf32, #tpu.memory_space<vmem>>, vector<1x128xf32>
      %12 = vector.broadcast %11 : vector<1x128xf32> to vector<32x128xf32>
      %13 = arith.addf %10, %12 : vector<32x128xf32>
      %cst_8 = arith.constant 0.000000e+00 : f32
      %14 = vector.broadcast %cst_8 : f32 to vector<32x128xf32>
      %15 = arith.maximumf %13, %14 : vector<32x128xf32>
      %16 = arith.truncf %15 : vector<32x128xf32> to vector<32x128xbf16>
      %c0_9 = arith.constant 0 : index
      %c0_10 = arith.constant 0 : index
      %17 = vector.load %arg5[%c0_9, %c0_10] : memref<128x128xbf16, #tpu.memory_space<vmem>>, vector<128x128xbf16>
      %cst_11 = arith.constant dense<0.000000e+00> : vector<32x128xf32>
      %18 = tpu.matmul %16, %17, %cst_11 {dimension_numbers = #tpu.dot_dimension_numbers<[1], [0], [0], [1], [0, 0, 1, 1], [], []>} : vector<32x128xbf16>, vector<128x128xbf16>, vector<32x128xf32> -> vector<32x128xf32>
      %c1 = arith.constant 1 : index
      %c0_12 = arith.constant 0 : index
      %19 = vector.load %arg6[%c1, %c0_12] : memref<2x128xf32, #tpu.memory_space<vmem>>, vector<1x128xf32>
      %20 = vector.broadcast %19 : vector<1x128xf32> to vector<32x128xf32>
      %21 = arith.addf %18, %20 : vector<32x128xf32>
      %22 = arith.index_cast %1 : i32 to index
      %c0_13 = arith.constant 0 : index
      %23 = vector.load %arg8[%22, %c0_13] : memref<64x128xf32, #tpu.memory_space<vmem>>, vector<32x128xf32>
      tpu.vector_store %arg8[%22, %c0_13], %21 {strides = array<i32>} : memref<64x128xf32, #tpu.memory_space<vmem>>, vector<32x128xf32>,
      %c0_14 = arith.constant 0 : index
      %24 = arith.index_cast %1 : i32 to index
      %c0_15 = arith.constant 0 : index
      %25 = vector.load %arg9[%c0_14, %24, %c0_15] : memref<2x64x128xf32, #tpu.memory_space<vmem>>, vector<1x32x128xf32>
      %26 = vector.shape_cast %25 : vector<1x32x128xf32> to vector<32x128xf32>
      %27 = vector.shape_cast %21 : vector<32x128xf32> to vector<1x32x128xf32>
      tpu.vector_store %arg9[%c0_14, %24, %c0_15], %27 {strides = array<i32>} : memref<2x64x128xf32, #tpu.memory_space<vmem>>, vector<1x32x128xf32>,
      %c0_16 = arith.constant 0 : index
      %c0_17 = arith.constant 0 : index
      %28 = vector.load %arg7[%c0_16, %c0_17] : memref<32x128xf32, #tpu.memory_space<vmem>>, vector<32x128xf32>
      tpu.vector_store %arg7[%c0_16, %c0_17], %21 {strides = array<i32>} : memref<32x128xf32, #tpu.memory_space<vmem>>, vector<32x128xf32>,
    } else {
    }
    %c0_i32_1 = arith.constant 0 : i32
    %5 = arith.cmpi sgt, %arg0, %c0_i32_1 : i32
    %6 = arith.extui %5 : i1 to i32
    %c0_i32_2 = arith.constant 0 : i32
    %7 = arith.cmpi ne, %6, %c0_i32_2 : i32
    scf.if %7 {
      %c1_i32 = arith.constant 1 : i32
      %8 = arith.subi %arg0, %c1_i32 : i32
      %c2_i32 = arith.constant 2 : i32
      %c0_i32_3 = arith.constant 0 : i32
      %9 = arith.cmpi eq, %c2_i32, %c0_i32_3 : i32
      %c1_i32_4 = arith.constant 1 : i32
      %10 = arith.select %9, %c1_i32_4, %c2_i32 : i32
      %11 = arith.remsi %8, %10 : i32
      %c0_i32_5 = arith.constant 0 : i32
      %12 = arith.cmpi ne, %11, %c0_i32_5 : i32
      %c0_i32_6 = arith.constant 0 : i32
      %13 = arith.cmpi slt, %11, %c0_i32_6 : i32
      %c0_i32_7 = arith.constant 0 : i32
      %14 = arith.cmpi slt, %10, %c0_i32_7 : i32
      %15 = arith.xori %13, %14 : i1
      %16 = arith.andi %15, %12 : i1
      %17 = arith.addi %11, %10 : i32
      %18 = arith.select %16, %17, %11 : i32
      %c2_i32_8 = arith.constant 2 : i32
      %c0_i32_9 = arith.constant 0 : i32
      %19 = arith.cmpi eq, %c2_i32_8, %c0_i32_9 : i32
      %c1_i32_10 = arith.constant 1 : i32
      %20 = arith.select %19, %c1_i32_10, %c2_i32_8 : i32
      %21 = arith.remsi %arg0, %20 : i32
      %c0_i32_11 = arith.constant 0 : i32
      %22 = arith.cmpi ne, %21, %c0_i32_11 : i32
      %c0_i32_12 = arith.constant 0 : i32
      %23 = arith.cmpi slt, %21, %c0_i32_12 : i32
      %c0_i32_13 = arith.constant 0 : i32
      %24 = arith.cmpi slt, %20, %c0_i32_13 : i32
      %25 = arith.xori %23, %24 : i1
      %26 = arith.andi %25, %22 : i1
      %27 = arith.addi %21, %20 : i32
      %28 = arith.select %26, %27, %21 : i32
      %29 = arith.index_cast %18 : i32 to index
      %c0 = arith.constant 0 : index
      %c0_14 = arith.constant 0 : index
      %30 = vector.load %arg9[%29, %c0, %c0_14] : memref<2x64x128xf32, #tpu.memory_space<vmem>>, vector<1x64x128xf32>
      %31 = vector.shape_cast %30 : vector<1x64x128xf32> to vector<64x128xf32>
      %c0_15 = arith.constant 0 : index
      %c0_16 = arith.constant 0 : index
      %32 = vector.load %arg3[%c0_15, %c0_16] : memref<32x64xbf16, #tpu.memory_space<vmem>>, vector<32x64xbf16>
      %33 = arith.truncf %31 : vector<64x128xf32> to vector<64x128xbf16>
      %cst = arith.constant dense<0.000000e+00> : vector<32x128xf32>
      %34 = tpu.matmul %32, %33, %cst {dimension_numbers = #tpu.dot_dimension_numbers<[1], [0], [0], [1], [0, 0, 1, 1], [], []>} : vector<32x64xbf16>, vector<64x128xbf16>, vector<32x128xf32> -> vector<32x128xf32>
      %cst_17 = arith.constant 0.899999976 : f32
      %35 = vector.broadcast %cst_17 : f32 to vector<32x128xf32>
      %36 = arith.mulf %35, %34 : vector<32x128xf32>
      %37 = arith.index_cast %1 : i32 to index
      %c0_18 = arith.constant 0 : index
      %38 = vector.load %arg8[%37, %c0_18] : memref<64x128xf32, #tpu.memory_space<vmem>>, vector<32x128xf32>
      %cst_19 = arith.constant 1.000000e-01 : f32
      %39 = vector.broadcast %cst_19 : f32 to vector<32x128xf32>
      %40 = arith.mulf %39, %38 : vector<32x128xf32>
      %41 = arith.addf %36, %40 : vector<32x128xf32>
      %42 = arith.index_cast %28 : i32 to index
      %43 = arith.index_cast %1 : i32 to index
      %c0_20 = arith.constant 0 : index
      %44 = vector.load %arg9[%42, %43, %c0_20] : memref<2x64x128xf32, #tpu.memory_space<vmem>>, vector<1x32x128xf32>
      %45 = vector.shape_cast %44 : vector<1x32x128xf32> to vector<32x128xf32>
      %46 = vector.shape_cast %41 : vector<32x128xf32> to vector<1x32x128xf32>
      tpu.vector_store %arg9[%42, %43, %c0_20], %46 {strides = array<i32>} : memref<2x64x128xf32, #tpu.memory_space<vmem>>, vector<1x32x128xf32>,
      %c10_i32 = arith.constant 10 : i32
      %47 = arith.cmpi slt, %arg0, %c10_i32 : i32
      %48 = arith.extui %47 : i1 to i32
      %c0_i32_21 = arith.constant 0 : i32
      %49 = arith.cmpi ne, %48, %c0_i32_21 : i32
      scf.if %49 {
        %c0_24 = arith.constant 0 : index
        %c0_25 = arith.constant 0 : index
        %53 = vector.load %arg7[%c0_24, %c0_25] : memref<32x128xf32, #tpu.memory_space<vmem>>, vector<32x128xf32>
        tpu.vector_store %arg7[%c0_24, %c0_25], %41 {strides = array<i32>} : memref<32x128xf32, #tpu.memory_space<vmem>>, vector<32x128xf32>,
      } else {
      }
      %c10_i32_22 = arith.constant 10 : i32
      %50 = arith.cmpi eq, %arg0, %c10_i32_22 : i32
      %51 = arith.extui %50 : i1 to i32
      %c0_i32_23 = arith.constant 0 : i32
      %52 = arith.cmpi ne, %51, %c0_i32_23 : i32
      scf.if %52 {
        %53 = tpu.iota {dimensions = array<i32: 1>} : vector<32x128xi32>
        %c8_i32 = arith.constant 8 : i32
        %54 = vector.broadcast %c8_i32 : i32 to vector<32x128xi32>
        %55 = arith.cmpi slt, %53, %54 : vector<32x128xi32>
        %cst_24 = arith.constant -1.000000e+30 : f32
        %56 = vector.broadcast %cst_24 : f32 to vector<32x128xf32>
        %57 = arith.select %55, %41, %56 : vector<32x128xi1>, vector<32x128xf32>
        %cst_25 = arith.constant dense<0xFF800000> : vector<32xf32>
        %58 = vector.multi_reduction <maximumf>, %57, %cst_25 [1] : vector<32x128xf32> to vector<32xf32>
        %59 = vector.shape_cast %58 : vector<32xf32> to vector<32x1xf32>
        %60 = vector.broadcast %59 : vector<32x1xf32> to vector<32x128xf32>
        %61 = arith.subf %57, %60 : vector<32x128xf32>
        %62 = math.exp %61 : vector<32x128xf32>
        %cst_26 = arith.constant dense<0.000000e+00> : vector<32xf32>
        %63 = vector.multi_reduction <add>, %62, %cst_26 [1] : vector<32x128xf32> to vector<32xf32>
        %64 = vector.shape_cast %63 : vector<32xf32> to vector<32x1xf32>
        %65 = math.log %64 : vector<32x1xf32>
        %66 = vector.broadcast %65 : vector<32x1xf32> to vector<32x128xf32>
        %67 = arith.subf %61, %66 : vector<32x128xf32>
        %c0_27 = arith.constant 0 : index
        %c0_28 = arith.constant 0 : index
        %68 = vector.load %arg7[%c0_27, %c0_28] : memref<32x128xf32, #tpu.memory_space<vmem>>, vector<32x128xf32>
        tpu.vector_store %arg7[%c0_27, %c0_28], %67 {strides = array<i32>} : memref<32x128xf32, #tpu.memory_space<vmem>>, vector<32x128xf32>,
      } else {
      }
    } else {
    }
    return
  }
  func.func @transform_0(%arg0: i32, %arg1: i32) -> (i32, i32) {
    %c0_i32 = arith.constant 0 : i32
    %c0_i32_0 = arith.constant 0 : i32
    return %arg1, %c0_i32 : i32, i32
  }
  func.func @transform_1(%arg0: i32, %arg1: i32) -> (i32, i32) {
    %c0_i32 = arith.constant 0 : i32
    %c0_i32_0 = arith.constant 0 : i32
    return %arg1, %c0_i32 : i32, i32
  }
  func.func @transform_2(%arg0: i32, %arg1: i32) -> (i32, i32) {
    %c0_i32 = arith.constant 0 : i32
    %c0_i32_0 = arith.constant 0 : i32
    %c0_i32_1 = arith.constant 0 : i32
    return %c0_i32, %c0_i32_0 : i32, i32
  }
  func.func @transform_3(%arg0: i32, %arg1: i32) -> (i32, i32) {
    %c0_i32 = arith.constant 0 : i32
    %c0_i32_0 = arith.constant 0 : i32
    %c0_i32_1 = arith.constant 0 : i32
    return %c0_i32, %c0_i32_0 : i32, i32
  }
  func.func @transform_4(%arg0: i32, %arg1: i32) -> (i32, i32) {
    %c0_i32 = arith.constant 0 : i32
    %c0_i32_0 = arith.constant 0 : i32
    %c0_i32_1 = arith.constant 0 : i32
    return %c0_i32, %c0_i32_0 : i32, i32
  }
  func.func @transform_5(%arg0: i32, %arg1: i32) -> (i32, i32) {
    %c0_i32 = arith.constant 0 : i32
    %c0_i32_0 = arith.constant 0 : i32
    return %arg1, %c0_i32 : i32, i32
  }
}

</mosaic_0001>

<bundles_post_ra>
// kernel: tpu_custom_call.1
= control target key start
LH: loop header
LB: loop body
LE: loop exit
PB: predicated region body
PF: predicated region fallthrough
CT: control target
= control target key end

     0   :  { %s1882_s0 = inlined_call_operand.hbm [shape: bf16[64,128], index: 0, kind: input, shape index: {}]   ;;  %s1883_s1 = inlined_call_operand.hbm [shape: bf16[64,64], index: 1, kind: input, shape index: {}]   ;;  %s1884_s2 = inlined_call_operand.hbm [shape: bf16[128,128], index: 2, kind: input, shape index: {}]   ;;  %s1885_s3 = inlined_call_operand.hbm [shape: bf16[128,128], index: 3, kind: input, shape index: {}]   ;;  %s1886_s4 = inlined_call_operand.vmem [shape: f32[2,128], index: 4, kind: input, shape index: {}]   ;;  %s1887_s5 = inlined_call_operand.hbm [shape: f32[64,128], index: 5, kind: output, shape index: {}]  }
   0x1   :  { %1899 = sst [smem:[#allocation24_spill]] %s1882_s0 }
   0x2   :  { %1900 = sst [smem:[#allocation25_spill]] %s1884_s2 }
   0x3   :  { %1901 = sst [smem:[#allocation26_spill]] %s1885_s3 }
   0x4   :  { %10 = vsyncpa [#allocation5], 0 }
   0x5   :  { %12 = vsyncpa [#allocation5 + $0x1], 0 }
   0x6   :  { %13 = vsyncpa [#allocation8], 0 }
   0x7   :  { %15 = vsyncpa [#allocation8 + $0x1], 0 }
   0x8   :  { %16 = vsyncpa [#allocation11], 0 }
   0x9   :  { %17 = vsyncpa [#allocation6], 0 }
   0xa   :  { %19 = vsyncpa [#allocation6 + $0x1], 0  ;;  %s1510_s18 = smov 0   ;;  %s1512_s19 = smov 0  }
   0xb   :  { %s1514_s20 = smov 0   ;;  %s1516_s21 = smov 0  }
   0xc   :  { %s1518_s22 = smov 0   ;;  %s1520_s23 = smov 0  }
   0xd   :  { %s1522_s24 = smov 0   ;;  %s1524_s25 = smov 0  }
   0xe LB: > { %1902 = sst [smem:[#allocation18_spill]] %s1461_s23  ;;  %s1551_s26 = sadd.s32 4294967295, %s1469_s25   ;;  %s1469_s25 = sphi %s1524_s25, %s25_s25   ;;  %s1465_s24 = sphi %s1522_s24, %s1933_s24   ;;  %s1461_s23 = sphi %s1520_s23, %s1932_s23   ;;  %s1457_s22 = sphi %s1518_s22, %s1931_s22   ;;  %s1453_s21 = sphi %s1516_s21, %s1930_s21   ;;  %s1449_s20 = sphi %s1514_s20, %s1936_s20   ;;  %s1445_s19 = sphi %s1512_s19, %s1935_s19   ;;  %s1441_s18 = sphi %s1510_s18, %s1934_s18  }
   0xf   : > { %1903 = sst [smem:[#allocation19_spill]] %s1465_s24  ;;  %s958_s27 = sadd.s32 4294967294, %s1469_s25  }
  0x10   : > { %p57_p0 = scmp.ne.s32.totalorder %s1445_s19, %s1441_s18  ;;  %p1888_p1 = scmp.eq.s32.totalorder %s1551_s26, 0 }
  0x11   : > { %p176_p3 = scmp.eq.s32.totalorder %s958_s27, 21  ;;  %p959_p5 = scmp.ge.s32.totalorder %s1469_s25, 1 }
  0x12   : > { %p1560_p4 = por %p1888_p1, %p57_p0  ;;  %p183_p7 = scmp.lt.s32.totalorder %s1469_s25, 23 }
  0x13   : > { %p1565_p6 = por %p176_p3, %p57_p0  ;;  %s1471_s6 = smov [#allocation9]  }
  0x14   : > { %s1904_s28 = scalar_select %p1560_p4, 1, 0 }
  0x15   : > { %s1905_s29 = scalar_select %p1565_p6, 1, 0 }
  0x16   : > { %p1570_p8 = pnand %p959_p5, %p183_p7  ;;  %s195_s7 = sshll.u32 %s1471_s6, 4  ;;  %s196_s7 = int_to_ptr.vmem [resolvable:$true] %s195_s7 }
  0x17   : > { %1906 = sst [smem:[#allocation20_spill]] %s1905_s29  ;;  %s1472_s9 = smov [#allocation10]  }
  0x18   : > { %s1907_s30 = scalar_select %p1570_p8, 1, 0 }
  0x19   : > { %p1113_p9 = pneg %p1570_p8  ;;  %s208_s10 = sshll.u32 %s1472_s9, 4  ;;  %s1582_s10 = int_to_ptr.vmem [resolvable:$true] %s208_s10 }
  0x1a   : > { %s1909_s2 = sld [smem:[#allocation25_spill]] }
  0x1b   : > { %p1578_p10 = pnand %p1113_p9, %p1888_p1 }
  0x1d   : > { %p1245_p12 = pneg %p1578_p10 }
  0x20   : > { %s1243_s13 = scalar_lea.hbm %s1909_s2, 1024 }
  0x21   : > { %p1244_p11 = scmp.ne.s32.totalorder %s1909_s2, %s1243_s13  ;;  %p1250_p3 = scmp.lt.u32.totalorder %s1243_s13, %s1909_s2 }
  0x23   : > { %p1246_p13 = pnand %p1245_p12, %p1244_p11 }
  0x25   : > { %p1247_p0 = pneg %p1246_p13 }
  0x27   : > { %p1252_p5 = pnand %p1250_p3, %p1247_p0 }
  0x29   : > { %1255 = shalt.err (!%p1252_p5)
}
  0x2a   : > { %s1256_s27 = scalar_lea.vmem %s196_s7, 1024  ;;  %p1264_p2 = scmp.lt.s32.totalorder %s196_s7, %s196_s7 }
  0x2b   : > { %p1257_p7 = scmp.ne.s32.totalorder %s196_s7, %s1256_s27  ;;  %p1265_p6 = scmp.lt.s32.totalorder %s1256_s27, %s1256_s27 }
  0x2d   : > { %p1259_p9 = pnand %p1257_p7, %p1245_p12  ;;  %p1266_p4 = por %p1265_p6, %p1264_p2 }
  0x2f   : > { %p1260_p1 = pneg %p1259_p9 }
  0x31   : > { %p1267_p8 = pnand %p1266_p4, %p1260_p1 }
  0x33   : > { %1270 = shalt.err (!%p1267_p8)
}
  0x34   : > { %s1892_s6 = smov 64   ;;  %s1894_s9 = smov 4  }
  0x35   : > { %1116 = dma.hbm_to_vmem [thread:$0]  (!%p1578_p10), %s1909_s2, 1024, %s196_s7, [#allocation8], %s1892_s6, %s1892_s6, %s1894_s9  }
  0x36   : > { %s1910_s3 = sld [smem:[#allocation26_spill]] }
  0x3c   : > { %s1271_s15 = scalar_lea.hbm %s1910_s3, 1024 }
  0x3d   : > { %p1272_p1 = scmp.ne.s32.totalorder %s1910_s3, %s1271_s15  ;;  %p1278_p6 = scmp.lt.u32.totalorder %s1271_s15, %s1910_s3 }
  0x3f   : > { %p1274_p2 = pnand %p1272_p1, %p1245_p12 }
  0x41   : > { %p1275_p4 = pneg %p1274_p2 }
  0x43   : > { %p1280_p8 = pnand %p1278_p6, %p1275_p4 }
  0x45   : > { %1283 = shalt.err (!%p1280_p8)
}
  0x46   : > { %s1284_s7 = scalar_lea.vmem %s1582_s10, 1024  ;;  %p1292_p3 = scmp.lt.s32.totalorder %s1582_s10, %s1582_s10 }
  0x47   : > { %p1285_p11 = scmp.ne.s32.totalorder %s1582_s10, %s1284_s7  ;;  %p1293_p5 = scmp.lt.s32.totalorder %s1284_s7, %s1284_s7 }
  0x49   : > { %p1287_p13 = pnand %p1285_p11, %p1245_p12  ;;  %p1294_p7 = por %p1293_p5, %p1292_p3 }
  0x4b   : > { %p1288_p0 = pneg %p1287_p13 }
  0x4d   : > { %p1295_p9 = pnand %p1294_p7, %p1288_p0 }
  0x4f   : > { %1298 = shalt.err (!%p1295_p9)
}
  0x50   : > { %1119 = dma.hbm_to_vmem [thread:$0]  (!%p1578_p10), %s1910_s3, 1024, %s1582_s10, [#allocation11], %s1892_s6, %s1892_s6, %s1894_s9  }
  0x51   : > { %s34_s8 = sadd.s32 1, %s1461_s23  ;;  %s37_s12 = sadd.s32 1, %s1465_s24 }
  0x52   : > { %p35_p12 = scmp.ge.s32.totalorder %s34_s8, 2  ;;  %s44_s13 = sadd.s32 1, %s1449_s20 }
  0x53   : > { %p51_p1 = scmp.ne.s32.totalorder %s1449_s20, %s1445_s19  ;;  %p52_p2 = scmp.eq.s32.totalorder %s1469_s25, 0 }
  0x54   : > { %s1938_s8 = smov (%p35_p12, %s34_s8), 0  ;;  %s1940_s12 = smov (!%p35_p12, %s37_s12), %s1465_s24 }
  0x55   : > { %1911 = sst [smem:[#allocation21_spill]] %s1938_s8  ;;  %s41_s14 = ssub.s32 %s1461_s23, %s1938_s8 }
  0x56   : > { %p1648_p4 = por %p52_p2, %p51_p1  ;;  %p39_p10 = scmp.ge.s32.totalorder %s1940_s12, 11 }
  0x57   : > { %p42_p6 = scmp.eq.s32.totalorder %s41_s14, 0  ;;  %p1913_p8 = scmp.eq.s32.totalorder %s1551_s26, 21 }
  0x58   : > { %p1133_p13 = scmp.lt.s32.totalorder %s1469_s25, 22  ;;  %s1942_s12 = smov (%p39_p10, %s1940_s12), 0 }
  0x59   : > { %p1654_p11 = por %p1913_p8, %p51_p1  ;;  %1915 = sst [smem:[#allocation22_spill]] %s1942_s12 }
  0x5a   : > { %s1662_s16 = scalar_select %p42_p6, %s1449_s20, %s44_s13  }
  0x5b   : > { %s225_s17 = sand.u32 1, %s1449_s20   ;;  %s1018_s27 = sshll.u32 %s1461_s23, 8 }
  0x5c   : > { %1916 = sst [smem:[#allocation23_spill]] %s1662_s16  ;;  %s1666_s7 = sshll.u32 %s225_s17, 4 }
  0x5d   : > { %s1917_s0 = sld [smem:[#allocation24_spill]]  ;;  %s229_s14 = scalar_lea.vmem [#allocation4], %s1666_s7 }
  0x5e   : > { %s236_s9 = sshll.u32 %s229_s14, 4  ;;  %p1676_p0 = pnand %p1133_p13, %p1648_p4  ;;  %s1680_s9 = int_to_ptr.vmem [resolvable:$true] %s236_s9 }
  0x5f   : > { %s1685_s11 = scalar_lea.hbm %s1883_s1, %s1018_s27  ;;  %s1687_s3 = scalar_lea.sflag [#allocation5], %s225_s17 }
  0x60   : > { %p1301_p5 = pneg %p1676_p0 }
  0x63   : > { %s1671_s6 = scalar_lea.hbm %s1917_s0, %s1018_s27  ;;  %s1304_s8 = scalar_lea.hbm %s1917_s0, 512 }
  0x64   : > { %s1299_s12 = scalar_lea.hbm %s1671_s6, 256  ;;  %p1305_p12 = scmp.lt.u32.totalorder %s1671_s6, %s1917_s0 }
  0x65   : > { %p1300_p3 = scmp.ne.s32.totalorder %s1671_s6, %s1299_s12  ;;  %p1306_p1 = scmp.lt.u32.totalorder %s1304_s8, %s1299_s12 }
  0x66   : > { %p1308_p4 = scmp.lt.u32.totalorder %s1299_s12, %s1671_s6 }
  0x67   : > { %p1302_p7 = pnand %p1301_p5, %p1300_p3  ;;  %p1307_p2 = por %p1306_p1, %p1305_p12 }
  0x69   : > { %p1303_p9 = pneg %p1302_p7  ;;  %p1309_p10 = por %p1308_p4, %p1307_p2 }
  0x6b   : > { %p1310_p6 = pnand %p1309_p10, %p1303_p9 }
  0x6d   : > { %1313 = shalt.err (!%p1310_p6)
}
  0x6e   : > { %s1314_s2 = scalar_lea.vmem %s1680_s9, 256  ;;  %s1475_s17 = smov [#allocation4]  }
  0x6f   : > { %p1315_p8 = scmp.ne.s32.totalorder %s1680_s9, %s1314_s2  ;;  %s1319_s27 = sshll.u32 %s1475_s17, 4  ;;  %s1320_s27 = int_to_ptr.vmem [resolvable:$false] %s1319_s27 }
  0x70   : > { %s1321_s23 = scalar_lea.vmem %s1320_s27, 512  ;;  %p1322_p7 = scmp.lt.s32.totalorder %s1680_s9, %s1320_s27 }
  0x71   : > { %p1317_p13 = pnand %p1315_p8, %p1301_p5  ;;  %p1323_p12 = scmp.lt.s32.totalorder %s1321_s23, %s1314_s2 }
  0x73   : > { %p1318_p3 = pneg %p1317_p13  ;;  %p1324_p1 = por %p1323_p12, %p1322_p7 }
  0x75   : > { %p1325_p2 = pnand %p1324_p1, %p1318_p3 }
  0x77   : > { %1328 = shalt.err (!%p1325_p2)
}
  0x78   : > { %s1919_s24 = smov 4   ;;  %s1920_s8 = smov 64  }
  0x79   : > { %1123 = dma.hbm_to_vmem [thread:$0]  (!%p1676_p0), %s1671_s6, 256, %s1680_s9, %s1687_s3, %s1920_s8, %s1920_s8, %s1919_s24  }
  0x7a   : > { %s250_s12 = scalar_lea.vmem [#allocation7], %s1666_s7  ;;  %s246_s15 = sand.u32 1, %s1469_s25  }
  0x7b   : > { %s257_s29 = sshll.u32 %s250_s12, 4  ;;  %s1722_s14 = scalar_lea.sflag [#allocation8], %s246_s15  ;;  %s1720_s29 = int_to_ptr.vmem [resolvable:$true] %s257_s29 }
  0x7c   : > { %s1329_s2 = scalar_lea.hbm %s1685_s11, 256  ;;  %s1334_s23 = scalar_lea.hbm %s1883_s1, 512 }
  0x7d   : > { %p1330_p9 = scmp.ne.s32.totalorder %s1685_s11, %s1329_s2  ;;  %p1335_p6 = scmp.lt.u32.totalorder %s1685_s11, %s1883_s1 }
  0x7e   : > { %p1336_p8 = scmp.lt.u32.totalorder %s1334_s23, %s1329_s2  ;;  %p1338_p3 = scmp.lt.u32.totalorder %s1329_s2, %s1685_s11 }
  0x7f   : > { %p1332_p4 = pnand %p1330_p9, %p1301_p5 }
  0x80   : > { %p1337_p13 = por %p1336_p8, %p1335_p6 }
  0x81   : > { %p1333_p10 = pneg %p1332_p4 }
  0x82   : > { %p1339_p7 = por %p1338_p3, %p1337_p13 }
  0x84   : > { %p1340_p12 = pnand %p1339_p7, %p1333_p10 }
  0x86   : > { %1343 = shalt.err (!%p1340_p12)
}
  0x87   : > { %s1344_s3 = scalar_lea.vmem %s1720_s29, 256  ;;  %s1476_s6 = smov [#allocation7]  }
  0x88   : > { %p1345_p1 = scmp.ne.s32.totalorder %s1720_s29, %s1344_s3  ;;  %s1349_s9 = sshll.u32 %s1476_s6, 4  ;;  %s1350_s9 = int_to_ptr.vmem [resolvable:$false] %s1349_s9 }
  0x89   : > { %s1351_s0 = scalar_lea.vmem %s1350_s9, 512  ;;  %p1352_p4 = scmp.lt.s32.totalorder %s1720_s29, %s1350_s9 }
  0x8a   : > { %p1347_p2 = pnand %p1345_p1, %p1301_p5  ;;  %p1353_p6 = scmp.lt.s32.totalorder %s1351_s0, %s1344_s3 }
  0x8c   : > { %p1348_p9 = pneg %p1347_p2  ;;  %p1354_p8 = por %p1353_p6, %p1352_p4 }
  0x8e   : > { %p1355_p13 = pnand %p1354_p8, %p1348_p9 }
  0x90   : > { %1358 = shalt.err (!%p1355_p13)
}
  0x91   : > { %1126 = dma.hbm_to_vmem [thread:$0]  (!%p1676_p0), %s1685_s11, 256, %s1720_s29, %s1722_s14, %s1920_s8, %s1920_s8, %s1919_s24  }
  0x92   : > { %p1921_p5 = scmp.ne.s32.totalorder %s1907_s30, 0 }
  0x93   : > { %s1754_s16 = sand.u32 (!%p1921_p5), 1, %s1445_s19   ;;  %p1922_p10 = scmp.ne.s32.totalorder (!%p1921_p5), %s1904_s28, 0 }
  0x94   : > { %269 = sbr.rel (%p1921_p5) target bundleno = 1251 (0x4e3), region = 40  ;;  %s970_s7 = sshll.u32 (!%p1921_p5), %s1754_s16, 4 }
  0x95   : > { %s272_s12 = scalar_lea.sflag (!%p1921_p5), [#allocation5], %s1754_s16  ;;  %s1758_s15 = scalar_lea.vmem (!%p1921_p5), [#allocation4], %s970_s7 }
  0x9b   : > { %1420 = dma.done.wait (%p1922_p10), %s272_s12, 256  }
  0x9c   : > { %1422 = vsyncadd (%p1922_p10), %s272_s12, 4294967040  ;;  %s280_s13 = sand.u32 1, %s1551_s26   ;;  %s1765_s11 = scalar_lea.vmem [#allocation7], %s970_s7 }
  0x9d   : > { %s281_s30 = scalar_lea.sflag [#allocation8], %s280_s13 }
  0x9e   : > { %1424 = dma.done.wait (%p1922_p10), %s281_s30, 256  }
  0x9f   : > { %1426 = vsyncadd (%p1922_p10), %s281_s30, 4294967040  ;;  %p1923_p0 = scmp.eq.s32.totalorder %s1551_s26, 0 }
  0xa1   : > { %1428 = dma.done.wait (%p1923_p0), [#allocation8], 1024   ;;  %p1924_p3 = pmov %p1923_p0 }
  0xa2   : > { %p1925_p7 = pmov %p1923_p0 }
  0xa3   : > { %1430 = vsyncadd (%p1924_p3), [#allocation8], 4294966272 }
  0xa4   : > { %1432 = dma.done.wait (%p1925_p7), [#allocation11], 1024   ;;  %p1926_p12 = pmov %p1923_p0 }
  0xa5   : > { %s974_s24 = sshll.u32 %s1754_s16, 5  ;;  %s1781_s8 = sshll.u32 %s1453_s21, 5 }
  0xa6   : > { %1434 = vsyncadd (%p1926_p12), [#allocation11], 4294966272  ;;  %s1783_s29 = scalar_lea.vmem [#allocation12], %s974_s24  ;;  %p976_p1 = scmp.ne.s32.totalorder %s1457_s22, 0 }
  0xa7   : > { %v1207_v0 = vld [vmem:[#allocation9] sm:$0xff] (!%p976_p1)   ;;  %v1208_v1 = vld [vmem:[#allocation9 + $0x8] sm:$0xff] (!%p976_p1)   ;;  %v1209_v2 = vld [vmem:[#allocation9 + $0x10] sm:$0xff] (!%p976_p1)   ;;  %s591_s17 = scalar_lea.vmem (!%p976_p1), [#allocation2], %s1781_s8  ;;  %s596_s27 = scalar_lea.vmem (!%p976_p1), [#allocation3], %s1781_s8 }
  0xa8   : > { %332 = sbr.rel (%p976_p1) target bundleno = 642 (0x282), region = 60  ;;  %1047 = vmatprep.subr.bf16.mxu0 (!%p976_p1), %v1207_v0  ;;  %v1210_v3 = vld [vmem:[#allocation9 + $0x18] sm:$0xff] (!%p976_p1)   ;;  %v1215_v4 = vld [vmem:[%s1758_s15] sm:$0xff] (!%p976_p1)   ;;  %v1218_v6 = vld [vmem:[#allocation10 + $0x8] sm:$0xff] (!%p976_p1)  }
  0xa9   : > { %1048 = vmatpush3.bf16.msra.mxu0 (!%p976_p1), %v1207_v0  ;;  %1063 = vmatprep.mubr.bf16.mxu0 (!%p976_p1), %v1215_v4  ;;  %v1217_v5 = vld [vmem:[#allocation10] sm:$0xff] (!%p976_p1)   ;;  %v1219_v8 = vld [vmem:[#allocation10 + $0x10] sm:$0xff] (!%p976_p1)   ;;  %v1212_v9 = vld [vmem:[#allocation9 + $0x28] sm:$0xff] (!%p976_p1)  }
  0xaa   : > { %1049 = vmatprep.subr.bf16.mxu0 (!%p976_p1), %v1208_v1  ;;  %v1211_v7 = vld [vmem:[#allocation9 + $0x20] sm:$0xff] (!%p976_p1)   ;;  %1067 = vmatprep.subr.bf16.mxu1 (!%p976_p1), %v1217_v5  ;;  %v1220_v10 = vld [vmem:[#allocation10 + $0x18] sm:$0xff] (!%p976_p1)   ;;  %v1213_v11 = vld [vmem:[#allocation9 + $0x30] sm:$0xff] (!%p976_p1)  }
  0xab   : > { %1068 = vmatpush3.bf16.msra.mxu1 (!%p976_p1), %v1217_v5  ;;  %v1221_v12 = vld [vmem:[#allocation10 + $0x20] sm:$0xff] (!%p976_p1)   ;;  %v1214_v13 = vld [vmem:[#allocation9 + $0x38] sm:$0xff] (!%p976_p1)   ;;  %v1222_v14 = vld [vmem:[#allocation10 + $0x28] sm:$0xff] (!%p976_p1)  }
  0xac   : > { %1069 = vmatprep.subr.bf16.mxu1 (!%p976_p1), %v1218_v6  ;;  %v1216_v15 = vld [vmem:[%s1758_s15 + $0x8] sm:$0xff] (!%p976_p1)   ;;  %v1223_v16 = vld [vmem:[#allocation10 + $0x30] sm:$0xff] (!%p976_p1)   ;;  %v977_v18 = vld [vmem:[%s1886_s4] ss:$0 sm:$0xff] (!%p976_p1) }
  0xad   : > { %1050 = vmatpush3.bf16.msra.mxu0 (!%p976_p1), %v1208_v1  ;;  %v1224_v17 = vld [vmem:[#allocation10 + $0x38] sm:$0xff] (!%p976_p1)   ;;  %v988_v33 = vld [vmem:[%s1886_s4 + $0x1] ss:$0 sm:$0xff] (!%p976_p1) }
  0xae   : > { %1051 = vmatprep.subr.bf16.mxu0 (!%p976_p1), %v1209_v2 }
  0xaf   : > { %1070 = vmatpush3.bf16.msra.mxu1 %v1218_v6 }
  0xb0   : > { %1071 = vmatprep.subr.bf16.mxu1 %v1219_v8 }
  0xb1   : > { %1052 = vmatpush3.bf16.msra.mxu0 %v1209_v2 }
  0xb2   : > { %1053 = vmatprep.subr.bf16.mxu0 %v1210_v3 }
  0xb3   : > { %1072 = vmatpush3.bf16.msra.mxu1 %v1219_v8 }
  0xb4   : > { %1073 = vmatprep.subr.bf16.mxu1 %v1220_v10 }
  0xb5   : > { %1054 = vmatpush3.bf16.msra.mxu0 %v1210_v3 }
  0xb6   : > { %1055 = vmatprep.subr.bf16.mxu0 %v1211_v7 }
  0xb7   : > { %1074 = vmatpush3.bf16.msra.mxu1 %v1220_v10 }
  0xb8   : > { %1075 = vmatprep.subr.bf16.mxu1 %v1221_v12 }
  0xb9   : > { %1056 = vmatpush3.bf16.msra.mxu0 %v1211_v7 }
  0xba   : > { %1057 = vmatprep.subr.bf16.mxu0 %v1212_v9 }
  0xbb   : > { %1076 = vmatpush3.bf16.msra.mxu1 %v1221_v12 }
  0xbc   : > { %1077 = vmatprep.subr.bf16.mxu1 %v1222_v14 }
  0xbd   : > { %1058 = vmatpush3.bf16.msra.mxu0 %v1212_v9 }
  0xbe   : > { %1059 = vmatprep.subr.bf16.mxu0 %v1213_v11 }
  0xbf   : > { %1078 = vmatpush3.bf16.msra.mxu1 %v1222_v14 }
  0xc0   : > { %1079 = vmatprep.subr.bf16.mxu1 %v1223_v16 }
  0xc1   : > { %1060 = vmatpush3.bf16.msra.mxu0 %v1213_v11 }
  0xc2   : > { %1061 = vmatprep.subr.bf16.mxu0 %v1214_v13 }
  0xc3   : > { %1080 = vmatpush3.bf16.msra.mxu1 %v1223_v16 }
  0xc4   : > { %1081 = vmatprep.subr.bf16.mxu1 %v1224_v17 }
  0xc5   : > { %1062 = vmatpush3.bf16.msra.mxu0 %v1214_v13 }
  0xc7   : > { %1082 = vmatpush3.bf16.msra.mxu1 %v1224_v17 }
  0xc8   : > { %1064 = vmatmul.mubr.bf16.vlgmr.msra.gmra.mrb[0].mxu0 %v1216_v15 }
 0x19b   : > { %v1065_v19 = vpop.f32.mrb[0].mxu0 }
 0x19c   : > { %v461_v20 = vadd.f32 %v1065_v19, %v977_v18  ;;  %v452_v21 = vpop.f32.mrb[1].mxu0 }
 0x19d   : > { %v453_v22 = vadd.f32 %v977_v18, %v452_v21  ;;  %v1066_v23 = vpop.f32.mrb[2].mxu0 }
 0x19e   : > { %v464_v24 = vadd.f32 %v1066_v23, %v977_v18  ;;  %v455_v25 = vpop.f32.mrb[3].mxu0  ;;  %v469_v27 = vmax.f32 %v461_v20, 0.0 }
 0x19f   : > { %v456_v26 = vadd.f32 %v977_v18, %v455_v25  ;;  %v467_v29 = vmax.f32 %v453_v22, 0.0 }
 0x1a0   : > { %v470_v28 = vmax.f32 %v464_v24, 0.0 }
 0x1a1   : > { %v468_v30 = vmax.f32 %v456_v26, 0.0 }
 0x1a2   : > { %v472_v31 = vpack.c.bf16 %v470_v28, %v469_v27 }
 0x1a3   : > { %v471_v32 = vpack.c.bf16 %v468_v30, %v467_v29 }
 0x1a5   : > { %1083 = vmatprep.mubr.bf16.mxu1 %v471_v32 }
 0x1a6   : > { %1084 = vmatmul.mubr.bf16.vlgmr.msra.gmra.mrb[0].mxu1 %v472_v31 }
 0x279   : > { %v1085_v34 = vpop.f32.mrb[0].mxu1 }
 0x27a   : > { %v585_v35 = vadd.f32 %v1085_v34, %v988_v33  ;;  %v576_v36 = vpop.f32.mrb[1].mxu1 }
 0x27b   : > { %v577_v37 = vadd.f32 %v988_v33, %v576_v36  ;;  %v1086_v38 = vpop.f32.mrb[2].mxu1 }
 0x27c   : > { %594 = vst [vmem:[%s591_s17 + $0x10] sm:$0xff] %v585_v35  ;;  %599 = vst [vmem:[%s596_s27 + $0x10] sm:$0xff] %v585_v35  ;;  %v588_v39 = vadd.f32 %v1086_v38, %v988_v33  ;;  %v579_v40 = vpop.f32.mrb[3].mxu1 }
 0x27d   : > { %603 = vst [vmem:[%s1783_s29 + $0x10] sm:$0xff] %v585_v35  ;;  %592 = vst [vmem:[%s591_s17] sm:$0xff] %v577_v37  ;;  %v580_v41 = vadd.f32 %v988_v33, %v579_v40 }
 0x27e   : > { %597 = vst [vmem:[%s596_s27] sm:$0xff] %v577_v37  ;;  %601 = vst [vmem:[%s1783_s29] sm:$0xff] %v577_v37 }
 0x27f   : > { %595 = vst [vmem:[%s591_s17 + $0x18] sm:$0xff] %v588_v39  ;;  %600 = vst [vmem:[%s596_s27 + $0x18] sm:$0xff] %v588_v39 }
 0x280   : > { %604 = vst [vmem:[%s1783_s29 + $0x18] sm:$0xff] %v588_v39  ;;  %593 = vst [vmem:[%s591_s17 + $0x8] sm:$0xff] %v580_v41 }
 0x281   : > { %598 = vst [vmem:[%s596_s27 + $0x8] sm:$0xff] %v580_v41  ;;  %602 = vst [vmem:[%s1783_s29 + $0x8] sm:$0xff] %v580_v41 }
 0x282 PF: > { %p997_p2 = scmp.le.s32.totalorder %s1457_s22, 0 }
 0x283   : > { %s998_s23 = sadd.s32 (!%p997_p2), 4294967295, %s1457_s22  ;;  %v1225_v42 = vld [vmem:[%s1765_s11] sm:$0xff] (!%p997_p2)   ;;  %vm662_vm0 = vcmask (!%p997_p2), 523264   ;;  %v1226_v55 = vld [vmem:[%s1765_s11 + $0x8] sm:$0xff] (!%p997_p2)   ;;  %s623_s13 = ssub.s32 (!%p997_p2), 0, %s1457_s22 }
 0x284   : > { %608 = sbr.rel (%p997_p2) target bundleno = 1226 (0x4ca), region = 64  ;;  %p610_p9 = scmp.lt.s32.totalorder (!%p997_p2), %s998_s23, 0  ;;  %1095 = vmatprep.mubr.msk.bf16.mxu0 (!%p997_p2), %vm662_vm0, %v1225_v42 }
 0x285   : > { %s611_s3 = ssub.s32 (!%p997_p2), 0, %s998_s23  ;;  %s1002_s30 = smin.u32 (!%p997_p2), %s1457_s22, %s623_s13 }
 0x286   : > { %s999_s6 = smin.u32 (!%p997_p2), %s998_s23, %s611_s3  ;;  %s625_s24 = sand.u32 (!%p997_p2), 1, %s1002_s30  }
 0x287   : > { %s613_s9 = sand.u32 (!%p997_p2), 1, %s999_s6   ;;  %p622_p6 = scmp.lt.s32.totalorder (!%p997_p2), %s1457_s22, 0 }
 0x288   : > { %s614_s0 = ssub.s32 (!%p997_p2), 0, %s613_s9  ;;  %s626_s26 = ssub.s32 (!%p997_p2), 0, %s625_s24 }
 0x289   : > { %s722_s14 = scalar_lea.vmem (!%p997_p2), [#allocation2], %s1781_s8  ;;  %p1011_p13 = scmp.ge.s32.totalorder (!%p997_p2), %s1457_s22, 10 }
 0x28a   : > { %v725_v56 = vld [vmem:[%s722_s14 + $0x10] sm:$0xff] (!%p997_p2)  ;;  %v723_v57 = vld [vmem:[%s722_s14] sm:$0xff] (!%p997_p2)  ;;  %v726_v58 = vld [vmem:[%s722_s14 + $0x18] sm:$0xff] (!%p997_p2) }
 0x28b   : > { %s1944_s0 = smov (!%p610_p9, %s614_s0), %s613_s9  ;;  %s1948_s26 = smov (!%p622_p6, %s626_s26), %s625_s24  ;;  %v729_v59 = vmul.f32 0.1, %v725_v56  ;;  %v724_v60 = vld [vmem:[%s722_s14 + $0x8] sm:$0xff]  ;;  %v727_v62 = vmul.f32 0.1, %v723_v57 }
 0x28c   : > { %p1001_p4 = scmp.lt.s32.totalorder %s1944_s0, 0  ;;  %s620_s7 = sadd.s32 2, %s1944_s0  ;;  %v730_v1 = vmul.f32 0.1, %v726_v58  ;;  %v728_v4 = vmul.f32 0.1, %v724_v60 }
 0x28d   : > { %p1004_p8 = scmp.lt.s32.totalorder %s1948_s26, 0  ;;  %s632_s28 = sadd.s32 2, %s1948_s26 }
 0x28e   : > { %s1946_s7 = smov (!%p1001_p4, %s620_s7), %s1944_s0 }
 0x28f   : > { %s1005_s12 = sshll.u32 %s1946_s7, 6  ;;  %s1950_s28 = smov (!%p1004_p8, %s632_s28), %s1948_s26 }
 0x290   : > { %s635_s15 = scalar_lea.vmem [#allocation3], %s1005_s12  ;;  %s1010_s2 = sshll.u32 %s1950_s28, 6 }
 0x291   : > { %v636_v43 = vld [vmem:[%s635_s15] sm:$0xff]  ;;  %v637_v44 = vld [vmem:[%s635_s15 + $0x8] sm:$0xff]  ;;  %v638_v45 = vld [vmem:[%s635_s15 + $0x10] sm:$0xff]  ;;  %s736_s11 = sadd.s32 %s1010_s2, %s1781_s8 }
 0x292   : > { %v648_v46 = vpack.c.bf16 %v637_v44, %v636_v43  ;;  %v639_v47 = vld [vmem:[%s635_s15 + $0x18] sm:$0xff]  ;;  %v640_v49 = vld [vmem:[%s635_s15 + $0x20] sm:$0xff]  ;;  %v641_v50 = vld [vmem:[%s635_s15 + $0x28] sm:$0xff]  ;;  %s737_s17 = scalar_lea.vmem [#allocation3], %s736_s11 }
 0x293   : > { %v649_v48 = vpack.c.bf16 %v639_v47, %v638_v45  ;;  %v650_v51 = vpack.c.bf16 %v641_v50, %v640_v49  ;;  %v642_v52 = vld [vmem:[%s635_s15 + $0x30] sm:$0xff]  ;;  %v643_v53 = vld [vmem:[%s635_s15 + $0x38] sm:$0xff] }
 0x294   : > { %1087 = vmatprep.subr.bf16.mxu0 %v648_v46  ;;  %v651_v54 = vpack.c.bf16 %v643_v53, %v642_v52 }
 0x295   : > { %1088 = vmatpush3.bf16.msra.mxu0 %v648_v46 }
 0x296   : > { %1089 = vmatprep.subr.bf16.mxu0 %v649_v48 }
 0x299   : > { %1090 = vmatpush3.bf16.msra.mxu0 %v649_v48 }
 0x29a   : > { %1091 = vmatprep.subr.bf16.mxu0 %v650_v51 }
 0x29d   : > { %1092 = vmatpush3.bf16.msra.mxu0 %v650_v51 }
 0x29e   : > { %1093 = vmatprep.subr.bf16.mxu0 %v651_v54 }
 0x2a1   : > { %1094 = vmatpush3.bf16.msra.mxu0 %v651_v54 }
 0x2a4   : > { %1096 = vmatmul.mubr.msk.bf16.vlgmr.msra.gmra.mrb[0].mxu0 %vm662_vm0, %v1226_v55 }
 0x377   : > { %v1097_v61 = vpop.f32.mrb[0].mxu0 }
 0x378   : > { %v720_v63 = vmul.f32 0.9, %v1097_v61  ;;  %v703_v0 = vpop.f32.mrb[1].mxu0 }
 0x379   : > { %v718_v2 = vmul.f32 0.9, %v703_v0  ;;  %v1098_v3 = vpop.f32.mrb[2].mxu0  ;;  %745 = sbr.rel (%p1011_p13) target bundleno = 896 (0x380), region = 68 }
 0x37a   : > { %v733_v5 = vadd.f32 %v729_v59, %v720_v63  ;;  %v721_v6 = vmul.f32 0.9, %v1098_v3  ;;  %v706_v7 = vpop.f32.mrb[3].mxu0 }
 0x37b   : > { %v731_v8 = vadd.f32 %v727_v62, %v718_v2  ;;  %v719_v9 = vmul.f32 0.9, %v706_v7 }
 0x37c   : > { %740 = vst [vmem:[%s737_s17 + $0x10] sm:$0xff] %v733_v5  ;;  %v734_v10 = vadd.f32 %v730_v1, %v721_v6  ;;  %748 = vst [vmem:[%s1783_s29 + $0x10] sm:$0xff] (!%p1011_p13), %v733_v5 }
 0x37d   : > { %738 = vst [vmem:[%s737_s17] sm:$0xff] %v731_v8  ;;  %v732_v11 = vadd.f32 %v728_v4, %v719_v9  ;;  %746 = vst [vmem:[%s1783_s29] sm:$0xff] (!%p1011_p13), %v731_v8 }
 0x37e   : > { %741 = vst [vmem:[%s737_s17 + $0x18] sm:$0xff] %v734_v10  ;;  %749 = vst [vmem:[%s1783_s29 + $0x18] sm:$0xff] (!%p1011_p13), %v734_v10 }
 0x37f   : > { %739 = vst [vmem:[%s737_s17 + $0x8] sm:$0xff] %v732_v11  ;;  %747 = vst [vmem:[%s1783_s29 + $0x8] sm:$0xff] (!%p1011_p13), %v732_v11 }
 0x380 PF: > { %p1012_p5 = scmp.ne.s32.totalorder %s1457_s22, 10 }
 0x381   : > { %v754_v12 = vlaneseq (!%p1012_p5) }
 0x382   : > { %753 = sbr.rel (%p1012_p5) target bundleno = 1226 (0x4ca), region = 72 }
 0x383   : > { %v755_v13 = vand.u32 (!%p1012_p5), 127, %v754_v12 }
 0x385   : > { %vm756_vm1 = vcmp.lt.s32.totalorder (!%p1012_p5), %v755_v13, 8 }
 0x386   : > { %v757_v14 = vsel (!%p1012_p5), %vm756_vm1, %v731_v8, -1e+30  ;;  %v759_v15 = vsel (!%p1012_p5), %vm756_vm1, %v733_v5, -1e+30  ;;  %v758_v16 = vsel (!%p1012_p5), %vm756_vm1, %v732_v11, -1e+30 }
 0x387   : > { %761 = vmax.xlane.f32.xlu0 (!%p1012_p5), %v757_v14  ;;  %765 = vmax.xlane.f32.xlu1 (!%p1012_p5), %v759_v15  ;;  %v760_v17 = vsel (!%p1012_p5), %vm756_vm1, %v734_v10, -1e+30 }
 0x38b   : > { %763 = vmax.xlane.f32.xlu0 %v758_v16  ;;  %767 = vmax.xlane.f32.xlu1 %v760_v17 }
 0x414   : > { %v762_v18 = vpop.xlane.xlu0 %761  ;;  %v766_v19 = vpop.xlane.xlu1 %765 }
 0x415   : > { %v769_v20 = vsub.f32 %v757_v14, %v762_v18  ;;  %v771_v21 = vsub.f32 %v759_v15, %v766_v19 }
 0x417   : > { %v773_v22 = vmul.f32 1.442695, %v769_v20  ;;  %v777_v23 = vmul.f32 1.442695, %v771_v21 }
 0x418   : > { %v764_v24 = vpop.xlane.xlu0 %763  ;;  %v768_v25 = vpop.xlane.xlu1 %767 }
 0x419   : > { %1227 = vpow2.f32 %v773_v22  ;;  %v770_v26 = vsub.f32 %v758_v16, %v764_v24  ;;  %v772_v27 = vsub.f32 %v760_v17, %v768_v25 }
 0x41a   : > { %1229 = vpow2.f32 %v777_v23 }
 0x41b   : > { %v775_v28 = vmul.f32 1.442695, %v770_v26  ;;  %v779_v29 = vmul.f32 1.442695, %v772_v27 }
 0x41d   : > { %1231 = vpow2.f32 %v775_v28 }
 0x41e   : > { %1233 = vpow2.f32 %v779_v29 }
 0x423   : > { %v1228_v30 = vpop.eup %1227 }
 0x424   : > { %781 = vadd.xlane.f32.xlu0 %v1228_v30  ;;  %v1230_v31 = vpop.eup %1229 }
 0x427   : > { %v1232_v32 = vpop.eup %1231 }
 0x428   : > { %785 = vadd.xlane.f32.xlu0 %v1230_v31  ;;  %783 = vadd.xlane.f32.xlu1 %v1232_v32  ;;  %v1234_v33 = vpop.eup %1233 }
 0x42c   : > { %787 = vadd.xlane.f32.xlu1 %v1234_v33 }
 0x4b1   : > { %v782_v34 = vpop.xlane.xlu0 %781 }
 0x4b2   : > { %1235 = vlog2.f32 %v782_v34 }
 0x4b5   : > { %v784_v35 = vpop.xlane.xlu1 %783  ;;  %v786_v36 = vpop.xlane.xlu0 %785 }
 0x4b6   : > { %1237 = vlog2.f32 %v784_v35 }
 0x4b7   : > { %1239 = vlog2.f32 %v786_v36 }
 0x4b9   : > { %v788_v37 = vpop.xlane.xlu1 %787 }
 0x4ba   : > { %1241 = vlog2.f32 %v788_v37 }
 0x4bc   : > { %v1236_v38 = vpop.eup %1235 }
 0x4bd   : > { %v790_v39 = vmul.f32 0.6931472, %v1236_v38 }
 0x4bf   : > { %v797_v40 = vsub.f32 %v769_v20, %v790_v39 }
 0x4c0   : > { %v1238_v41 = vpop.eup %1237 }
 0x4c1   : > { %v1240_v42 = vpop.eup %1239  ;;  %801 = vst [vmem:[%s1783_s29] sm:$0xff] %v797_v40  ;;  %v792_v43 = vmul.f32 0.6931472, %v1238_v41 }
 0x4c2   : > { %v794_v44 = vmul.f32 0.6931472, %v1240_v42 }
 0x4c3   : > { %v798_v45 = vsub.f32 %v770_v26, %v792_v43 }
 0x4c4   : > { %v1242_v46 = vpop.eup %1241  ;;  %v799_v47 = vsub.f32 %v771_v21, %v794_v44 }
 0x4c5   : > { %802 = vst [vmem:[%s1783_s29 + $0x8] sm:$0xff] %v798_v45  ;;  %v796_v48 = vmul.f32 0.6931472, %v1242_v46 }
 0x4c6   : > { %803 = vst [vmem:[%s1783_s29 + $0x10] sm:$0xff] %v799_v47 }
 0x4c7   : > { %v800_v49 = vsub.f32 %v772_v27, %v796_v48 }
 0x4c9   : > { %804 = vst [vmem:[%s1783_s29 + $0x18] sm:$0xff] %v800_v49 }
 0x4ca PF: > { %s1020_s22 = sshll.u32 %s1453_s21, 9  ;;  %s819_s3 = sshll.u32 %s1783_s29, 4  ;;  %s1828_s3 = int_to_ptr.vmem [resolvable:$true] %s819_s3 }
 0x4cb   : > { %s1825_s23 = scalar_lea.hbm %s1887_s5, %s1020_s22  ;;  %s806_s6 = scalar_lea.sflag [#allocation6], %s1754_s16 }
 0x4cc   : > { %s1359_s9 = scalar_lea.vmem %s1828_s3, 512  ;;  %s1477_s0 = smov [#allocation12]  }
 0x4cd   : > { %p1360_p10 = scmp.ne.s32.totalorder %s1828_s3, %s1359_s9  ;;  %s1363_s7 = sshll.u32 %s1477_s0, 4  ;;  %s1364_s7 = int_to_ptr.vmem [resolvable:$false] %s1363_s7 }
 0x4ce   : > { %s1365_s21 = scalar_lea.vmem %s1364_s7, 1024  ;;  %p1366_p7 = scmp.lt.s32.totalorder %s1828_s3, %s1364_s7 }
 0x4cf   : > { %p1361_p0 = pnand %p1360_p10, %p1654_p11  ;;  %p1367_p12 = scmp.lt.s32.totalorder %s1365_s21, %s1359_s9 }
 0x4d1   : > { %p1362_p3 = pneg %p1361_p0  ;;  %p1368_p1 = por %p1367_p12, %p1366_p7 }
 0x4d3   : > { %p1369_p2 = pnand %p1368_p1, %p1362_p3 }
 0x4d5   : > { %1372 = shalt.err (!%p1369_p2)
}
 0x4d6   : > { %s1373_s29 = scalar_lea.hbm %s1825_s23, 512  ;;  %s1377_s13 = scalar_lea.hbm %s1887_s5, 1024 }
 0x4d7   : > { %p1374_p9 = scmp.ne.s32.totalorder %s1825_s23, %s1373_s29  ;;  %p1378_p8 = scmp.lt.u32.totalorder %s1825_s23, %s1887_s5 }
 0x4d8   : > { %p1379_p13 = scmp.lt.u32.totalorder %s1377_s13, %s1373_s29  ;;  %p1381_p10 = scmp.lt.u32.totalorder %s1373_s29, %s1825_s23 }
 0x4d9   : > { %p1375_p4 = pnand %p1374_p9, %p1654_p11 }
 0x4da   : > { %p1380_p5 = por %p1379_p13, %p1378_p8 }
 0x4db   : > { %p1376_p6 = pneg %p1375_p4 }
 0x4dc   : > { %p1382_p0 = por %p1381_p10, %p1380_p5 }
 0x4de   : > { %p1383_p3 = pnand %p1382_p0, %p1376_p6 }
 0x4e0   : > { %1386 = shalt.err (!%p1383_p3)
}
 0x4e1   : > { %s1478_s26 = smov 128   ;;  %s1479_s28 = smov 8  }
 0x4e2   : > { %1111 = dma.vmem_to_hbm [thread:$0]  (%p1654_p11), %s1828_s3, 512, %s1825_s23, %s806_s6, %s1478_s26, %s1478_s26, %s1479_s28  }
 0x4e3 PF: > { %s1927_s14 = sld [smem:[#allocation20_spill]]  ;;  %p1136_p7 = scmp.ge.s32.totalorder %s1469_s25, 2 }
 0x4e4   : > { %s834_s2 = sand.u32 1, %s1441_s18  }
 0x4e5   : > { %s835_s11 = scalar_lea.sflag [#allocation6], %s834_s2 }
 0x4e9   : > { %p1928_p12 = scmp.ne.s32.totalorder %s1927_s14, 0 }
 0x4eb   : > { %p1128_p1 = pnand %p1136_p7, %p1928_p12 }
 0x4ed   : > { %1436 = dma.done.wait (!%p1128_p1), %s835_s11, 512  }
 0x4ee   : > { %1438 = vsyncadd (!%p1128_p1), %s835_s11, 4294966784  ;;  %s25_s25 = sadd.s32 1, %s1469_s25   ;;  %s1929_s17 = sld [smem:[#allocation23_spill]] }
 0x4ef   : > { %p22_p2 = scmp.ge.s32.totalorder %s25_s25, 24   ;;  %s1930_s21 = sld [smem:[#allocation18_spill]] }
 0x4f0   : > { %s1931_s22 = sld [smem:[#allocation19_spill]]  ;;  %s1932_s23 = sld [smem:[#allocation21_spill]] }
 0x4f1   : > { %s1933_s24 = sld [smem:[#allocation22_spill]]  ;;  %s1934_s18 = smov %s1445_s19 }
 0x4f2   : > { %s1935_s19 = smov %s1449_s20  ;;  %24 = sbr.rel (!%p22_p2) target bundleno = 14 (0xe), region = 127 }
 0x4f4   : > { %s1936_s20 = smov %s1929_s17 }
 0x4f9   :  { %840 = vsyncpa [#allocation5], 1 }
 0x4fa   :  { %842 = vsyncpa [#allocation5 + $0x1], 1 }
 0x4fb   :  { %843 = vsyncpa [#allocation8], 1 }
 0x4fc   :  { %845 = vsyncpa [#allocation8 + $0x1], 1 }
 0x4fd   :  { %846 = vsyncpa [#allocation11], 1 }
 0x4fe   :  { %847 = vsyncpa [#allocation6], 1 }
 0x4ff   :  { %849 = vsyncpa [#allocation6 + $0x1], 1 }

</bundles_post_ra>
